<compile_context>
chip_gen: v7x
topology: tpu7x:2x2x1
jax: 0.10.0
libtpu: 0.0.40
codegen_flags: <defaults>
</compile_context>

<pallas_src>
import jax
import jax.numpy as jnp
from jax.experimental import pallas as pl
from jax.experimental.pallas import tpu as pltpu

ROW = 30
H = 256


def _round_up(n, m):
    return ((n + m - 1) // m) * m


def _device_kind():
    try:
        return jax.devices()[0].device_kind.lower()
    except Exception:
        return ""


def _default_epilogue_dtype():
    # bf16 VALU/EUP only exist on v6e/v7x; elsewhere keep the epilogue in f32
    # (v5e is MXU-bound and has no bf16 VPU, so bf16 would not help there).
    kind = _device_kind()
    if ("v6" in kind) or ("v7" in kind):
        return jnp.bfloat16
    return jnp.float32


def _mlp_kernel(x_ref, w1_ref, b1_ref, w2_ref, b2_ref, w3_ref, b3_ref, o_ref):
    ep = b1_ref.dtype  # epilogue dtype: f32 on v5e, bf16 on v6e/v7x

    # fc1: bf16 MXU matmul with f32 accumulation. The bf16 cast of the
    # (TB, 30) x tile happens here (rides in VPU/DMA slack) instead of as a
    # separate XLA pass over x in HBM.
    h1 = jnp.dot(x_ref[...].astype(jnp.bfloat16), w1_ref[...],
                 preferred_element_type=jnp.float32)
    h1 = jnp.maximum(h1.astype(ep) + b1_ref[...], 0)

    # fc2: dominant 256x256 layer, bf16 operands, f32 accumulation.
    h2 = jnp.dot(h1.astype(jnp.bfloat16), w2_ref[...],
                 preferred_element_type=jnp.float32)
    h2 = jnp.maximum(h2.astype(ep) + b2_ref[...], 0)

    # fc3 (out_features=1): VPU multiply + XLU lane reduction with f32
    # accumulation. Reshape so the per-row result lands directly in the
    # lane-dense (TB//128, 128) output layout (dense vst, dense writeback).
    p = (h2 * w3_ref[...]).astype(jnp.float32)                 # (TB, H)
    rows, lanes = o_ref.shape[1], o_ref.shape[2]
    y = jnp.sum(p.reshape(rows, lanes, p.shape[-1]), axis=-1)  # (TB//128, 128)

    # b3 lives in SMEM as a scalar.
    o_ref[0] = y + b3_ref[0]


def krad_forward(x, params, *, block_b=2048):
    """x: (B, ROW) float32 -> (B, 1) float32."""
    w1, b1, w2, b2, w3, b3 = params
    B = x.shape[0]
    kind = _device_kind()
    ep = _default_epilogue_dtype()

    # Batch tile: a multiple of 128 (lane-dense output rows), large enough to
    # amortize the per-grid-step overhead, small enough for scoped VMEM.
    TB = _round_up(min(block_b, _round_up(B, 128)), 128)
    if ("v5 lite" in kind) or ("v5e" in kind):
        TB = min(TB, 2048)           # v5e scoped-VMEM default is only 16 MiB
    if "v7" in kind:
        # v7x has 2 TensorCores: ensure the "parallel" batch axis has at least
        # two grid steps so both cores get work.
        half = _round_up(pl.cdiv(B, 2), 128)
        if 128 <= half < TB:
            TB = half

    num_blocks = pl.cdiv(B, TB)      # last block may overhang; tail is garbage
    rows = TB // 128

    # Tiny parameter-side casts (a few hundred KiB total, one-off): bf16 MXU
    # operands, epilogue-dtype biases / fc3 row, scalar b3 for SMEM.
    # x itself is deliberately NOT touched in the wrapper.
    w1_bf = w1.astype(jnp.bfloat16)                 # (30, 256)
    w2_bf = w2.astype(jnp.bfloat16)                 # (256, 256)
    b1_e = b1.reshape(1, H).astype(ep)
    b2_e = b2.reshape(1, H).astype(ep)
    w3_e = w3.reshape(1, H).astype(ep)              # fc3 weights as a row
    b3_s = b3.reshape(1).astype(jnp.float32)        # SMEM scalar

    flops = 2 * B * (ROW * H + H * H + H)
    bytes_accessed = (B * (ROW + 1) * 4                       # x read + y write
                      + 2 * (ROW * H + H * H + H)             # bf16 weights
                      + 4 * (2 * H + 1))                      # biases
    cost = pl.CostEstimate(flops=flops, transcendentals=0,
                           bytes_accessed=int(bytes_accessed))

    # TB=2048 uses ~7 MiB of VMEM (x tile, h1/h2 temporaries, ~0.3 MiB of
    # resident weights) and fits every generation's scoped default; only raise
    # the limit if a larger tile was explicitly requested (never on v5e/v7x
    # defaults). 48 MiB stays below v7x's 64 MiB physical VMEM.
    vmem_limit = 48 * 1024 * 1024 if TB > 2048 else None

    # Constant index_maps keep weights/biases VMEM-resident: Pallas skips
    # re-issuing their DMAs when the block index does not change, so the only
    # cost of default double-buffering is ~0.3 MiB of VMEM (not worth the
    # compile risk of pipeline_mode=pl.Buffered(1)).
    const = lambda shape: pl.BlockSpec(shape, lambda i: (0, 0))

    out = pl.pallas_call(
        _mlp_kernel,
        out_shape=jax.ShapeDtypeStruct((num_blocks, rows, 128), jnp.float32),
        grid=(num_blocks,),
        in_specs=[
            pl.BlockSpec((TB, ROW), lambda i: (i, 0)),   # x: batch-tiled, pipelined
            const((ROW, H)),                             # w1 (VMEM-resident)
            const((1, H)),                               # b1
            const((H, H)),                               # w2
            const((1, H)),                               # b2
            const((1, H)),                               # w3 row
            pl.BlockSpec(memory_space=pltpu.MemorySpace.SMEM),  # b3 scalar
        ],
        out_specs=pl.BlockSpec((1, rows, 128), lambda i: (i, 0, 0)),
        compiler_params=pltpu.CompilerParams(
            dimension_semantics=("parallel",),           # shard tiles across TCs
            vmem_limit_bytes=vmem_limit,
        ),
        cost_estimate=cost,
    )(x, w1_bf, b1_e, w2_bf, b2_e, w3_e, b3_s)

    # Lane-dense slab -> (B, 1); rows from the ragged/padded tail are dropped.
    return out.reshape(num_blocks * TB, 1)[:B]


def init_params(key):
    """Deterministic PyTorch-style init: U(-1/sqrt(fan_in), 1/sqrt(fan_in))."""
    ks = jax.random.split(key, 6)

    def lin(kw, kb, fan_in, fan_out):
        bound = 1.0 / jnp.sqrt(fan_in)
        w = jax.random.uniform(kw, (fan_in, fan_out), jnp.float32, -bound, bound)
        b = jax.random.uniform(kb, (1, fan_out), jnp.float32, -bound, bound)
        return w, b

    w1, b1 = lin(ks[0], ks[1], ROW, H)
    w2, b2 = lin(ks[2], ks[3], H, H)
    w3, b3 = lin(ks[4], ks[5], H, 1)
    return (w1, b1, w2, b2, w3, b3)


def krad_reference_f32(x, params):
    """Pure f32 reference (exact PyTorch semantics)."""
    w1, b1, w2, b2, w3, b3 = params
    h1 = jnp.maximum(x @ w1 + b1, 0.0)
    h2 = jnp.maximum(h1 @ w2 + b2, 0.0)
    return h2 @ w3 + b3


def krad_reference_matched(x, params, epilogue_dtype):
    """Precision-matched reference mirroring the kernel's math exactly."""
    w1, b1, w2, b2, w3, b3 = params
    bf, ep = jnp.bfloat16, epilogue_dtype
    h1 = jnp.dot(x.astype(bf), w1.astype(bf), preferred_element_type=jnp.float32)
    h1 = jnp.maximum(h1.astype(ep) + b1.astype(ep), 0)
    h2 = jnp.dot(h1.astype(bf), w2.astype(bf), preferred_element_type=jnp.float32)
    h2 = jnp.maximum(h2.astype(ep) + b2.astype(ep), 0)
    p = (h2 * w3.reshape(1, H).astype(ep)).astype(jnp.float32)
    return jnp.sum(p, axis=-1, keepdims=True) + b3


if __name__ == "__main__":
    key = jax.random.PRNGKey(0)
    k_x, k_p = jax.random.split(key)
    params = init_params(k_p)
    ep = _default_epilogue_dtype()

    # Small demo batches: B=8 (single 128-row tile) and B=200 (exercises the
    # ragged last block / partial-block read path).
    for B in (8, 200):
        x = jax.random.normal(jax.random.fold_in(k_x, B), (B, ROW), jnp.float32)

        out = jax.block_until_ready(krad_forward(x, params))
        assert out.shape == (B, 1), out.shape

        # Tight check against the precision-matched reference.
        ref_m = krad_reference_matched(x, params, ep)
        assert jnp.allclose(out, ref_m, atol=2e-3, rtol=2e-3), \
            f"mismatch vs matched reference at B={B}"

        # Loose check against the exact PyTorch-semantics f32 reference.
        ref_f = krad_reference_f32(x, params)
        assert jnp.allclose(out, ref_f, atol=5e-2, rtol=5e-2), \
            f"mismatch vs f32 reference at B={B}"

    print("KERNEL_OK")
</pallas_src>

<mosaic_0001>
module attributes {stable_mosaic.version = 11 : i64} {
  func.func @_mlp_kernel(%arg0: i32, %arg1: memref<128x30xf32, #tpu.memory_space<vmem>>, %arg2: memref<30x256xbf16, #tpu.memory_space<vmem>>, %arg3: memref<1x256xf32, #tpu.memory_space<vmem>>, %arg4: memref<256x256xbf16, #tpu.memory_space<vmem>>, %arg5: memref<1x256xf32, #tpu.memory_space<vmem>>, %arg6: memref<1x256xf32, #tpu.memory_space<vmem>>, %arg7: memref<1xf32, #tpu.memory_space<smem>>, %arg8: memref<1x1x128xf32, #tpu.memory_space<vmem>>) attributes {dimension_semantics = [#tpu.dimension_semantics<parallel>], iteration_bounds = array<i64: 1>, scalar_prefetch = 0 : i64, scratch_operands = 0 : i64, tpu.core_type = #tpu.core_type<tc>, window_params = [{transform_indices = @transform_0, window_bounds = array<i64: 128, 30>}, {pipeline_mode = #tpu.pipeline_mode<synchronous>, transform_indices = @transform_1, window_bounds = array<i64: 30, 256>}, {pipeline_mode = #tpu.pipeline_mode<synchronous>, transform_indices = @transform_2, window_bounds = array<i64: 1, 256>}, {pipeline_mode = #tpu.pipeline_mode<synchronous>, transform_indices = @transform_3, window_bounds = array<i64: 256, 256>}, {pipeline_mode = #tpu.pipeline_mode<synchronous>, transform_indices = @transform_4, window_bounds = array<i64: 1, 256>}, {pipeline_mode = #tpu.pipeline_mode<synchronous>, transform_indices = @transform_5, window_bounds = array<i64: 1, 256>}, {transform_indices = @transform_6, window_bounds = array<i64: 1>}, {transform_indices = @transform_7, window_bounds = array<i64: 1, 1, 128>}]} {
    %c0 = arith.constant 0 : index
    %c0_0 = arith.constant 0 : index
    %0 = vector.load %arg1[%c0, %c0_0] : memref<128x30xf32, #tpu.memory_space<vmem>>, vector<128x30xf32>
    %1 = arith.truncf %0 : vector<128x30xf32> to vector<128x30xbf16>
    %c0_1 = arith.constant 0 : index
    %c0_2 = arith.constant 0 : index
    %2 = vector.load %arg2[%c0_1, %c0_2] : memref<30x256xbf16, #tpu.memory_space<vmem>>, vector<30x256xbf16>
    %cst = arith.constant dense<0.000000e+00> : vector<128x256xf32>
    %3 = tpu.matmul %1, %2, %cst {dimension_numbers = #tpu.dot_dimension_numbers<[1], [0], [0], [1], [0, 0, 1, 1], [], []>} : vector<128x30xbf16>, vector<30x256xbf16>, vector<128x256xf32> -> vector<128x256xf32>
    %c0_3 = arith.constant 0 : index
    %c0_4 = arith.constant 0 : index
    %4 = vector.load %arg3[%c0_3, %c0_4] : memref<1x256xf32, #tpu.memory_space<vmem>>, vector<1x256xf32>
    %5 = vector.broadcast %4 : vector<1x256xf32> to vector<128x256xf32>
    %6 = arith.addf %3, %5 : vector<128x256xf32>
    %cst_5 = arith.constant 0.000000e+00 : f32
    %7 = vector.broadcast %cst_5 : f32 to vector<128x256xf32>
    %8 = arith.maximumf %6, %7 : vector<128x256xf32>
    %9 = arith.truncf %8 : vector<128x256xf32> to vector<128x256xbf16>
    %c0_6 = arith.constant 0 : index
    %c0_7 = arith.constant 0 : index
    %10 = vector.load %arg4[%c0_6, %c0_7] : memref<256x256xbf16, #tpu.memory_space<vmem>>, vector<256x256xbf16>
    %cst_8 = arith.constant dense<0.000000e+00> : vector<128x256xf32>
    %11 = tpu.matmul %9, %10, %cst_8 {dimension_numbers = #tpu.dot_dimension_numbers<[1], [0], [0], [1], [0, 0, 1, 1], [], []>} : vector<128x256xbf16>, vector<256x256xbf16>, vector<128x256xf32> -> vector<128x256xf32>
    %c0_9 = arith.constant 0 : index
    %c0_10 = arith.constant 0 : index
    %12 = vector.load %arg5[%c0_9, %c0_10] : memref<1x256xf32, #tpu.memory_space<vmem>>, vector<1x256xf32>
    %13 = vector.broadcast %12 : vector<1x256xf32> to vector<128x256xf32>
    %14 = arith.addf %11, %13 : vector<128x256xf32>
    %cst_11 = arith.constant 0.000000e+00 : f32
    %15 = vector.broadcast %cst_11 : f32 to vector<128x256xf32>
    %16 = arith.maximumf %14, %15 : vector<128x256xf32>
    %c0_12 = arith.constant 0 : index
    %c0_13 = arith.constant 0 : index
    %17 = vector.load %arg6[%c0_12, %c0_13] : memref<1x256xf32, #tpu.memory_space<vmem>>, vector<1x256xf32>
    %18 = vector.broadcast %17 : vector<1x256xf32> to vector<128x256xf32>
    %19 = arith.mulf %16, %18 : vector<128x256xf32>
    %20 = vector.shape_cast %19 : vector<128x256xf32> to vector<1x128x256xf32>
    %cst_14 = arith.constant dense<0.000000e+00> : vector<1x128xf32>
    %21 = vector.multi_reduction <add>, %20, %cst_14 [2] : vector<1x128x256xf32> to vector<1x128xf32>
    %c0_15 = arith.constant 0 : index
    %22 = memref.load %arg7[%c0_15] : memref<1xf32, #tpu.memory_space<smem>>
    %23 = vector.broadcast %22 : f32 to vector<1x128xf32>
    %24 = arith.addf %21, %23 : vector<1x128xf32>
    %c0_16 = arith.constant 0 : index
    %c0_17 = arith.constant 0 : index
    %c0_18 = arith.constant 0 : index
    %25 = vector.load %arg8[%c0_16, %c0_17, %c0_18] : memref<1x1x128xf32, #tpu.memory_space<vmem>>, vector<1x1x128xf32>
    %26 = vector.shape_cast %25 : vector<1x1x128xf32> to vector<1x128xf32>
    %27 = vector.shape_cast %24 : vector<1x128xf32> to vector<1x1x128xf32>
    tpu.vector_store %arg8[%c0_16, %c0_17, %c0_18], %27 {strides = array<i32>} : memref<1x1x128xf32, #tpu.memory_space<vmem>>, vector<1x1x128xf32>,
    return
  }
  func.func @transform_0(%arg0: i32) -> (i32, i32) {
    %c0_i32 = arith.constant 0 : i32
    %c0_i32_0 = arith.constant 0 : i32
    return %arg0, %c0_i32 : i32, i32
  }
  func.func @transform_1(%arg0: i32) -> (i32, i32) {
    %c0_i32 = arith.constant 0 : i32
    %c0_i32_0 = arith.constant 0 : i32
    %c0_i32_1 = arith.constant 0 : i32
    return %c0_i32, %c0_i32_0 : i32, i32
  }
  func.func @transform_2(%arg0: i32) -> (i32, i32) {
    %c0_i32 = arith.constant 0 : i32
    %c0_i32_0 = arith.constant 0 : i32
    %c0_i32_1 = arith.constant 0 : i32
    return %c0_i32, %c0_i32_0 : i32, i32
  }
  func.func @transform_3(%arg0: i32) -> (i32, i32) {
    %c0_i32 = arith.constant 0 : i32
    %c0_i32_0 = arith.constant 0 : i32
    %c0_i32_1 = arith.constant 0 : i32
    return %c0_i32, %c0_i32_0 : i32, i32
  }
  func.func @transform_4(%arg0: i32) -> (i32, i32) {
    %c0_i32 = arith.constant 0 : i32
    %c0_i32_0 = arith.constant 0 : i32
    %c0_i32_1 = arith.constant 0 : i32
    return %c0_i32, %c0_i32_0 : i32, i32
  }
  func.func @transform_5(%arg0: i32) -> (i32, i32) {
    %c0_i32 = arith.constant 0 : i32
    %c0_i32_0 = arith.constant 0 : i32
    %c0_i32_1 = arith.constant 0 : i32
    return %c0_i32, %c0_i32_0 : i32, i32
  }
  func.func @transform_6(%arg0: i32) -> i32 {
    %c0_i32 = arith.constant 0 : i32
    %c0_i32_0 = arith.constant 0 : i32
    return %c0_i32 : i32
  }
  func.func @transform_7(%arg0: i32) -> (i32, i32, i32) {
    %c0_i32 = arith.constant 0 : i32
    %c0_i32_0 = arith.constant 0 : i32
    %c0_i32_1 = arith.constant 0 : i32
    return %arg0, %c0_i32, %c0_i32_0 : i32, i32, i32
  }
}

</mosaic_0001>

<bundles_post_ra>
// kernel: tpu_custom_call.1
= control target key start
LH: loop header
LB: loop body
LE: loop exit
PB: predicated region body
PF: predicated region fallthrough
CT: control target
= control target key end

     0   :  { %13 = vsyncpa [#allocation4], 0  ;;  %s1477_s0 = inlined_call_operand.hbm [shape: f32[8,30], index: 0, kind: input, shape index: {}]   ;;  %s1478_s1 = inlined_call_operand.hbm [shape: bf16[30,256], index: 1, kind: input, shape index: {}]   ;;  %s1479_s2 = inlined_call_operand.vmem [shape: f32[1,256], index: 2, kind: input, shape index: {}]   ;;  %s1480_s3 = inlined_call_operand.hbm [shape: bf16[256,256], index: 3, kind: input, shape index: {}]   ;;  %s1481_s4 = inlined_call_operand.vmem [shape: f32[1,256], index: 4, kind: input, shape index: {}]   ;;  %s1482_s5 = inlined_call_operand.vmem [shape: f32[1,256], index: 5, kind: input, shape index: {}]   ;;  %s1483_s6 = inlined_call_operand.<no memory space> [shape: f32[1], index: 6, kind: input, shape index: {}]   ;;  %s1484_s7 = inlined_call_operand.hbm [shape: f32[1,1,128], index: 7, kind: output, shape index: {}]  }
   0x1   :  { %14 = vsyncpa [#allocation7], 0 }
   0x2   :  { %15 = vsyncpa [#allocation5], 0 }
   0x3   :  { %20 = vsyncadd [#allocation4], 1920  ;;  %s1157_s24 = smov [#allocation6]   ;;  %s1158_s26 = smov [#allocation3]  }
   0x4   :  { %s33_s25 = sshll.u32 %s1157_s24, 4  ;;  %s21_s27 = sshll.u32 %s1158_s26, 4  ;;  %s34_s25 = int_to_ptr.vmem [resolvable:$true] %s33_s25  ;;  %s1204_s27 = int_to_ptr.vmem [resolvable:$true] %s21_s27 }
   0x5   :  { %s1063_s30 = scalar_lea.hbm %s1478_s1, 512 }
   0x6   :  { %p1064_p0 = scmp.ne.s32.totalorder %s1478_s1, %s1063_s30  ;;  %p1067_p1 = scmp.lt.u32.totalorder %s1063_s30, %s1478_s1 }
   0x8   :  { %p1069_p2 = pnand %p1067_p1, %p1064_p0 }
   0xa   :  { %1072 = shalt.err (!%p1069_p2)
}
   0xb   :  { %s1073_s12 = scalar_lea.vmem %s34_s25, 512  ;;  %p1078_p4 = scmp.lt.s32.totalorder %s34_s25, %s34_s25 }
   0xc   :  { %p1074_p3 = scmp.ne.s32.totalorder %s34_s25, %s1073_s12  ;;  %p1079_p5 = scmp.lt.s32.totalorder %s1073_s12, %s1073_s12 }
   0xe   :  { %p1080_p6 = por %p1079_p5, %p1078_p4 }
  0x10   :  { %p1081_p7 = pnand %p1080_p6, %p1074_p3 }
  0x12   :  { %1084 = shalt.err (!%p1081_p7)
}
  0x13   :  { %s1159_s13 = smov 128   ;;  %s1160_s14 = smov 8  }
  0x14   :  { %39 = dma.hbm_to_vmem [thread:$0]  %s1478_s1, 512, %s34_s25, [#allocation7], %s1159_s13, %s1159_s13, %s1160_s14  }
  0x15   :  { %s1085_s19 = scalar_lea.hbm %s1477_s0, 128 }
  0x16   :  { %p1086_p8 = scmp.ne.s32.totalorder %s1477_s0, %s1085_s19  ;;  %p1089_p9 = scmp.lt.u32.totalorder %s1085_s19, %s1477_s0 }
  0x18   :  { %p1091_p10 = pnand %p1089_p9, %p1086_p8 }
  0x1a   :  { %1094 = shalt.err (!%p1091_p10)
}
  0x1b   :  { %s1095_s24 = scalar_lea.vmem %s1204_s27, 128  ;;  %s1099_s1 = scalar_lea.vmem %s1204_s27, 2048 }
  0x1c   :  { %p1096_p11 = scmp.ne.s32.totalorder %s1204_s27, %s1095_s24  ;;  %p1100_p12 = scmp.lt.s32.totalorder %s1204_s27, %s1204_s27 }
  0x1d   :  { %p1101_p13 = scmp.lt.s32.totalorder %s1099_s1, %s1095_s24 }
  0x1f   :  { %p1102_p0 = por %p1101_p13, %p1100_p12 }
  0x21   :  { %p1103_p1 = pnand %p1102_p0, %p1096_p11 }
  0x23   :  { %1106 = shalt.err (!%p1103_p1)
}
  0x24   :  { %27 = dma.hbm_to_vmem [thread:$0]  %s1477_s0, 128, %s1204_s27, [#allocation4], %s1159_s13, %s1159_s13, %s1160_s14  }
  0x25   :  { %s1161_s28 = smov [#allocation8]   ;;  %s1107_s9 = scalar_lea.hbm %s1480_s3, 4096 }
  0x26   :  { %s47_s29 = sshll.u32 %s1161_s28, 4  ;;  %p1108_p2 = scmp.ne.s32.totalorder %s1480_s3, %s1107_s9  ;;  %s48_s29 = int_to_ptr.vmem [resolvable:$true] %s47_s29 }
  0x27   :  { %p1111_p3 = scmp.lt.u32.totalorder %s1107_s9, %s1480_s3 }
  0x29   :  { %p1113_p4 = pnand %p1111_p3, %p1108_p2 }
  0x2b   :  { %1116 = shalt.err (!%p1113_p4)
}
  0x2c   :  { %s1117_s16 = scalar_lea.vmem %s48_s29, 4096  ;;  %p1122_p6 = scmp.lt.s32.totalorder %s48_s29, %s48_s29 }
  0x2d   :  { %p1118_p5 = scmp.ne.s32.totalorder %s48_s29, %s1117_s16  ;;  %p1123_p7 = scmp.lt.s32.totalorder %s1117_s16, %s1117_s16 }
  0x2f   :  { %p1124_p8 = por %p1123_p7, %p1122_p6 }
  0x31   :  { %p1125_p9 = pnand %p1124_p8, %p1118_p5 }
  0x33   :  { %1128 = shalt.err (!%p1125_p9)
}
  0x34   :  { %53 = dma.hbm_to_vmem [thread:$0]  %s1480_s3, 4096, %s48_s29, [#allocation7], %s1159_s13, %s1159_s13, %s1160_s14  }
  0x35   :  { %1151 = dma.done.wait [#allocation4], 2048  }
  0x36   :  { %1152 = vsyncadd [#allocation4], 4294965248 }
  0x37   :  { %1153 = dma.done.wait [#allocation7], 4608  }
  0x38   :  { %1154 = vsyncadd [#allocation7], 4294962688  ;;  %v1162_v0 = vmov 0   ;;  %v1009_v1 = vld [vmem:[#allocation6 + $0x4] ss:$8 sps:$4 sm:$0xff]   ;;  %vm153_vm0 = vcmask 1046528   ;;  %v100_v62 = vlaneseq }
  0x39   :  { %192 = vmatprep.mubr.bf16.mxu0 %v1162_v0  ;;  %v1011_v2 = vld [vmem:[#allocation6] ss:$8 sps:$4 sm:$0xff]   ;;  %160 = vmatprep.subr.bf16.mxu0 %v1009_v1  ;;  %v1012_v3 = vld [vmem:[#allocation6 + $0x14] ss:$8 sps:$4 sm:$0x7f]   ;;  %vm128_vm1 = vcmask 244736  }
  0x3a   :  { %v1014_v4 = vld [vmem:[#allocation6 + $0x10] ss:$8 sps:$4 sm:$0x7f]   ;;  %161 = vmatpush1.bf16.msra.mxu0 %v1011_v2  ;;  %v70_v5 = vld [vmem:[#allocation3] sm:$0xff]  ;;  %v71_v6 = vld [vmem:[#allocation3 + $0x8] sm:$0xff]  ;;  %v1274_v63 = vshrl.u32 %v100_v62, 7 }
  0x3b   :  { %929 = vmatprep.subr.msk.bf16.mxu0 %vm153_vm0, %v1012_v3  ;;  %v155_v7 = vsel %vm153_vm0, %v1014_v4, 0  ;;  %v86_v8 = vpack.c.bf16 %v71_v6, %v70_v5  ;;  %v1015_v9 = vld [vmem:[#allocation8] ss:$8 sps:$4 sm:$0xff]   ;;  %v1017_v10 = vld [vmem:[#allocation8 + $0x4] ss:$8 sps:$4 sm:$0xff]   ;;  %v72_v11 = vld [vmem:[#allocation3 + $0x10] sm:$0xff] }
  0x3c   :  { %v1020_v12 = vld [vmem:[#allocation8 + $0x14] ss:$8 sps:$4 sm:$0xff]   ;;  %v1018_v14 = vld [vmem:[#allocation8 + $0x10] ss:$8 sps:$4 sm:$0xff]   ;;  %970 = vmatprep.subr.bf16.mxu1 %v1017_v10  ;;  %v1023_v15 = vld [vmem:[#allocation8 + $0x24] ss:$8 sps:$4 sm:$0xff]  }
  0x3d   :  { %v73_v13 = vld [vmem:[#allocation3 + $0x18] sm:$0xff]  ;;  %986 = vmatpush1.bf16.msra.mxu1 %v1015_v9  ;;  %v1021_v17 = vld [vmem:[#allocation8 + $0x20] ss:$8 sps:$4 sm:$0xff]   ;;  %v1029_v22 = vld [vmem:[#allocation8 + $0x44] ss:$8 sps:$4 sm:$0xff]   ;;  %v1283_v2 = vsub.s32 1, %v1274_v63 }
  0x3e   :  { %163 = vmatpush1.bf16.msra.mxu0 %v155_v7  ;;  %v87_v16 = vpack.c.bf16 %v73_v13, %v72_v11  ;;  %971 = vmatprep.subr.bf16.mxu1 %v1020_v12  ;;  %v1026_v18 = vld [vmem:[#allocation8 + $0x34] ss:$8 sps:$4 sm:$0xff]   ;;  %v74_v19 = vld [vmem:[#allocation3 + $0x20] sm:$0xff]  ;;  %v75_v20 = vld [vmem:[#allocation3 + $0x28] sm:$0xff]  ;;  %vm807_vm2 = vcmask 130112   ;;  %vm814_vm3 = vcmask 195712  }
  0x3f   :  { %525 = vmatprep.subr.bf16.mxu0 %v1017_v10  ;;  %v1024_v21 = vld [vmem:[#allocation8 + $0x30] ss:$8 sps:$4 sm:$0xff]   ;;  %v88_v23 = vpack.c.bf16 %v75_v20, %v74_v19  ;;  %v1027_v24 = vld [vmem:[#allocation8 + $0x40] ss:$8 sps:$4 sm:$0xff]   ;;  %v1032_v25 = vld [vmem:[#allocation8 + $0x54] ss:$8 sps:$4 sm:$0xff]  }
  0x40   :  { %v76_v26 = vld [vmem:[#allocation3 + $0x30] sm:$0xff]  ;;  %v77_v27 = vld [vmem:[#allocation3 + $0x38] sm:$0xff]  ;;  %v1035_v29 = vld [vmem:[#allocation8 + $0x64] ss:$8 sps:$4 sm:$0xff]   ;;  %vm821_vm4 = vcmask 261312   ;;  %vm828_vm5 = vcmask 326912  }
  0x41   :  { %930 = vmatmul.mubr.msk.bf16.vlgmr.msra.gmra.mrb[0].mxu0 %vm128_vm1, %v86_v8  ;;  %987 = vmatpush1.bf16.msra.mxu1 %v1018_v14  ;;  %v1030_v28 = vld [vmem:[#allocation8 + $0x50] ss:$8 sps:$4 sm:$0xff]   ;;  %v89_v30 = vpack.c.bf16 %v77_v27, %v76_v26  ;;  %v1033_v31 = vld [vmem:[#allocation8 + $0x60] ss:$8 sps:$4 sm:$0xff]   ;;  %v1038_v32 = vld [vmem:[#allocation8 + $0x74] ss:$8 sps:$4 sm:$0xff]  }
  0x42   :  { %202 = vmatprep.mubr.bf16.mxu0 %v1162_v0  ;;  %526 = vmatpush1.bf16.msra.mxu0 %v1015_v9  ;;  %v78_v33 = vld [vmem:[#allocation3 + $0x40] sm:$0xff]  ;;  %v79_v34 = vld [vmem:[#allocation3 + $0x48] sm:$0xff]  ;;  %v1036_v35 = vld [vmem:[#allocation8 + $0x70] ss:$8 sps:$4 sm:$0xff]   ;;  %vm835_vm6 = vcmask 392512   ;;  %vm842_vm7 = vcmask 458112  }
  0x43   :  { %527 = vmatprep.subr.bf16.mxu0 %v1020_v12  ;;  %972 = vmatprep.subr.bf16.mxu1 %v1023_v15  ;;  %v1041_v36 = vld [vmem:[#allocation8 + $0x84] ss:$8 sps:$4 sm:$0xff]   ;;  %v90_v37 = vpack.c.bf16 %v79_v34, %v78_v33  ;;  %v1039_v38 = vld [vmem:[#allocation8 + $0x80] ss:$8 sps:$4 sm:$0xff]   ;;  %v1044_v39 = vld [vmem:[#allocation8 + $0x94] ss:$8 sps:$4 sm:$0xff]  }
  0x44   :  { %v80_v40 = vld [vmem:[#allocation3 + $0x50] sm:$0xff]  ;;  %v81_v41 = vld [vmem:[#allocation3 + $0x58] sm:$0xff]  ;;  %v1047_v43 = vld [vmem:[#allocation8 + $0xa4] ss:$8 sps:$4 sm:$0xff]   ;;  %vm849_vm8 = vcmask 523712   ;;  %vm856_vm9 = vcmask 589312  }
  0x45   :  { %988 = vmatpush1.bf16.msra.mxu1 %v1021_v17  ;;  %v1042_v42 = vld [vmem:[#allocation8 + $0x90] ss:$8 sps:$4 sm:$0xff]   ;;  %v91_v44 = vpack.c.bf16 %v81_v41, %v80_v40  ;;  %v1045_v45 = vld [vmem:[#allocation8 + $0xa0] ss:$8 sps:$4 sm:$0xff]   ;;  %v1050_v46 = vld [vmem:[#allocation8 + $0xb4] ss:$8 sps:$4 sm:$0xff]  }
  0x46   :  { %528 = vmatpush1.bf16.msra.mxu0 %v1018_v14  ;;  %973 = vmatprep.subr.bf16.mxu1 %v1026_v18  ;;  %v82_v47 = vld [vmem:[#allocation3 + $0x60] sm:$0xff]  ;;  %v83_v48 = vld [vmem:[#allocation3 + $0x68] sm:$0xff]  ;;  %v1048_v49 = vld [vmem:[#allocation8 + $0xb0] ss:$8 sps:$4 sm:$0xff]   ;;  %vm863_vm10 = vcmask 654912   ;;  %vm870_vm11 = vcmask 720512  }
  0x47   :  { %529 = vmatprep.subr.bf16.mxu0 %v1023_v15  ;;  %v1053_v50 = vld [vmem:[#allocation8 + $0xc4] ss:$8 sps:$4 sm:$0xff]   ;;  %v92_v51 = vpack.c.bf16 %v83_v48, %v82_v47  ;;  %v1051_v52 = vld [vmem:[#allocation8 + $0xc0] ss:$8 sps:$4 sm:$0xff]   ;;  %v1056_v53 = vld [vmem:[#allocation8 + $0xd4] ss:$8 sps:$4 sm:$0xff]  }
  0x48   :  { %v84_v54 = vld [vmem:[#allocation3 + $0x70] sm:$0xff]  ;;  %v85_v55 = vld [vmem:[#allocation3 + $0x78] sm:$0xff]  ;;  %v1059_v58 = vld [vmem:[#allocation8 + $0xe4] ss:$8 sps:$4 sm:$0xff]   ;;  %vm877_vm12 = vcmask 786112   ;;  %vm884_vm13 = vcmask 851712  }
  0x49   :  { %931 = vmatmul.mubr.msk.bf16.gmra.mrb[4].mxu0 %vm128_vm1, %v87_v16  ;;  %989 = vmatpush1.bf16.msra.mxu1 %v1024_v21  ;;  %v1054_v56 = vld [vmem:[#allocation8 + $0xd0] ss:$8 sps:$4 sm:$0xff]   ;;  %v93_v57 = vpack.c.bf16 %v85_v55, %v84_v54  ;;  %v1057_v59 = vld [vmem:[#allocation8 + $0xe0] ss:$8 sps:$4 sm:$0xff]   ;;  %v1062_v60 = vld [vmem:[#allocation8 + $0xf4] ss:$8 sps:$4 sm:$0xff]  }
  0x4a   :  { %212 = vmatprep.mubr.bf16.mxu0 %v1162_v0  ;;  %530 = vmatpush1.bf16.msra.mxu0 %v1021_v17  ;;  %v1060_v61 = vld [vmem:[#allocation8 + $0xf0] ss:$8 sps:$4 sm:$0xff]   ;;  %v98_v1 = vld [vmem:[%s1479_s2] sm:$0x3]  ;;  %vm891_vm14 = vcmask 917312   ;;  %vm898_vm15 = vcmask 982912  }
  0x4b   :  { %531 = vmatprep.subr.bf16.mxu0 %v1026_v18  ;;  %974 = vmatprep.subr.bf16.mxu1 %v1029_v22  ;;  %v1289_v4 = vrot.slane %v98_v1, %v1283_v2  ;;  %vm905_vm0 = vcmask 1048512  }
  0x4d   :  { %990 = vmatpush1.bf16.msra.mxu1 %v1027_v24 }
  0x4e   :  { %532 = vmatpush1.bf16.msra.mxu0 %v1024_v21  ;;  %975 = vmatprep.subr.bf16.mxu1 %v1032_v25 }
  0x4f   :  { %533 = vmatprep.subr.bf16.mxu0 %v1029_v22 }
  0x51   :  { %932 = vmatmul.mubr.msk.bf16.gmra.mrb[8].mxu0 %vm128_vm1, %v88_v23  ;;  %991 = vmatpush1.bf16.msra.mxu1 %v1030_v28 }
  0x52   :  { %222 = vmatprep.mubr.bf16.mxu0 %v1162_v0  ;;  %534 = vmatpush1.bf16.msra.mxu0 %v1027_v24 }
  0x53   :  { %535 = vmatprep.subr.bf16.mxu0 %v1032_v25  ;;  %976 = vmatprep.subr.bf16.mxu1 %v1035_v29 }
  0x55   :  { %992 = vmatpush1.bf16.msra.mxu1 %v1033_v31 }
  0x56   :  { %536 = vmatpush1.bf16.msra.mxu0 %v1030_v28  ;;  %977 = vmatprep.subr.bf16.mxu1 %v1038_v32 }
  0x57   :  { %537 = vmatprep.subr.bf16.mxu0 %v1035_v29 }
  0x59   :  { %933 = vmatmul.mubr.msk.bf16.gmra.mrb[12].mxu0 %vm128_vm1, %v89_v30  ;;  %993 = vmatpush1.bf16.msra.mxu1 %v1036_v35 }
  0x5a   :  { %232 = vmatprep.mubr.bf16.mxu0 %v1162_v0  ;;  %538 = vmatpush1.bf16.msra.mxu0 %v1033_v31 }
  0x5b   :  { %539 = vmatprep.subr.bf16.mxu0 %v1038_v32  ;;  %978 = vmatprep.subr.bf16.mxu1 %v1041_v36 }
  0x5d   :  { %994 = vmatpush1.bf16.msra.mxu1 %v1039_v38 }
  0x5e   :  { %540 = vmatpush1.bf16.msra.mxu0 %v1036_v35  ;;  %979 = vmatprep.subr.bf16.mxu1 %v1044_v39 }
  0x5f   :  { %541 = vmatprep.subr.bf16.mxu0 %v1041_v36 }
  0x61   :  { %934 = vmatmul.mubr.msk.bf16.gmra.mrb[16].mxu0 %vm128_vm1, %v90_v37  ;;  %995 = vmatpush1.bf16.msra.mxu1 %v1042_v42 }
  0x62   :  { %242 = vmatprep.mubr.bf16.mxu0 %v1162_v0  ;;  %542 = vmatpush1.bf16.msra.mxu0 %v1039_v38 }
  0x63   :  { %543 = vmatprep.subr.bf16.mxu0 %v1044_v39  ;;  %980 = vmatprep.subr.bf16.mxu1 %v1047_v43 }
  0x65   :  { %996 = vmatpush1.bf16.msra.mxu1 %v1045_v45 }
  0x66   :  { %544 = vmatpush1.bf16.msra.mxu0 %v1042_v42  ;;  %981 = vmatprep.subr.bf16.mxu1 %v1050_v46 }
  0x67   :  { %545 = vmatprep.subr.bf16.mxu0 %v1047_v43 }
  0x69   :  { %935 = vmatmul.mubr.msk.bf16.gmra.mrb[20].mxu0 %vm128_vm1, %v91_v44  ;;  %997 = vmatpush1.bf16.msra.mxu1 %v1048_v49 }
  0x6a   :  { %252 = vmatprep.mubr.bf16.mxu0 %v1162_v0  ;;  %546 = vmatpush1.bf16.msra.mxu0 %v1045_v45 }
  0x6b   :  { %547 = vmatprep.subr.bf16.mxu0 %v1050_v46  ;;  %982 = vmatprep.subr.bf16.mxu1 %v1053_v50 }
  0x6d   :  { %998 = vmatpush1.bf16.msra.mxu1 %v1051_v52 }
  0x6e   :  { %548 = vmatpush1.bf16.msra.mxu0 %v1048_v49  ;;  %983 = vmatprep.subr.bf16.mxu1 %v1056_v53 }
  0x6f   :  { %549 = vmatprep.subr.bf16.mxu0 %v1053_v50 }
  0x71   :  { %936 = vmatmul.mubr.msk.bf16.gmra.mrb[24].mxu0 %vm128_vm1, %v92_v51  ;;  %999 = vmatpush1.bf16.msra.mxu1 %v1054_v56 }
  0x72   :  { %262 = vmatprep.mubr.bf16.mxu0 %v1162_v0  ;;  %550 = vmatpush1.bf16.msra.mxu0 %v1051_v52  ;;  %v1277_v0 = vsub.s32 0, %v1274_v63 }
  0x73   :  { %551 = vmatprep.subr.bf16.mxu0 %v1056_v53  ;;  %984 = vmatprep.subr.bf16.mxu1 %v1059_v58 }
  0x74   :  { %v1286_v3 = vrot.slane %v98_v1, %v1277_v0 }
  0x75   :  { %1000 = vmatpush1.bf16.msra.mxu1 %v1057_v59 }
  0x76   :  { %552 = vmatpush1.bf16.msra.mxu0 %v1054_v56  ;;  %985 = vmatprep.subr.bf16.mxu1 %v1062_v60 }
  0x77   :  { %553 = vmatprep.subr.bf16.mxu0 %v1059_v58 }
  0x79   :  { %937 = vmatmul.mubr.msk.bf16.gmra.mrb[28].mxu0 %vm128_vm1, %v93_v57  ;;  %1001 = vmatpush1.bf16.msra.mxu1 %v1060_v61 }
  0x7a   :  { %554 = vmatpush1.bf16.msra.mxu0 %v1057_v59 }
  0x7b   :  { %555 = vmatprep.subr.bf16.mxu0 %v1062_v60 }
  0x7e   :  { %556 = vmatpush1.bf16.msra.mxu0 %v1060_v61 }
 0x114   :  { %v194_v5 = vpop.f32.mrb[0].mxu0 }
 0x115   :  { %v195_v6 = vadd.f32 %v194_v5, %v1286_v3  ;;  %v196_v7 = vpop.f32.mrb[1].mxu0 }
 0x116   :  { %v197_v8 = vadd.f32 %v196_v7, %v1289_v4  ;;  %v198_v9 = vpop.f32.mrb[2].mxu0 }
 0x117   :  { %v199_v10 = vadd.f32 %v198_v9, %v1286_v3  ;;  %v200_v11 = vpop.f32.mrb[3].mxu0  ;;  %v273_v13 = vmax.f32 %v195_v6, 0.0 }
 0x118   :  { %v201_v12 = vadd.f32 %v200_v11, %v1289_v4  ;;  %v274_v15 = vmax.f32 %v197_v8, 0.0 }
 0x119   :  { %v275_v14 = vmax.f32 %v199_v10, 0.0 }
 0x11a   :  { %v276_v16 = vmax.f32 %v201_v12, 0.0 }
 0x11b   :  { %v305_v17 = vpack.c.bf16 %v275_v14, %v273_v13 }
 0x11c   :  { %v306_v18 = vpack.c.bf16 %v276_v16, %v274_v15  ;;  %v204_v19 = vpop.f32.mrb[4].mxu0 }
 0x11d   :  { %v205_v20 = vadd.f32 %v204_v19, %v1286_v3  ;;  %v206_v21 = vpop.f32.mrb[5].mxu0 }
 0x11e   :  { %v207_v22 = vadd.f32 %v206_v21, %v1289_v4  ;;  %v208_v23 = vpop.f32.mrb[6].mxu0  ;;  %557 = vmatprep.mubr.bf16.mxu0 %v306_v18 }
 0x11f   :  { %v209_v24 = vadd.f32 %v208_v23, %v1286_v3  ;;  %v210_v25 = vpop.f32.mrb[7].mxu0  ;;  %558 = vmatmul.mubr.bf16.vlgmr.msra.gmra.mrb[32].mxu0 %v305_v17  ;;  %v277_v27 = vmax.f32 %v205_v20, 0.0 }
 0x120   :  { %v211_v26 = vadd.f32 %v210_v25, %v1289_v4  ;;  %v278_v29 = vmax.f32 %v207_v22, 0.0 }
 0x121   :  { %v279_v28 = vmax.f32 %v209_v24, 0.0 }
 0x122   :  { %v280_v30 = vmax.f32 %v211_v26, 0.0 }
 0x123   :  { %v307_v31 = vpack.c.bf16 %v279_v28, %v277_v27 }
 0x124   :  { %v308_v32 = vpack.c.bf16 %v280_v30, %v278_v29  ;;  %v214_v33 = vpop.f32.mrb[8].mxu0 }
 0x125   :  { %v215_v34 = vadd.f32 %v214_v33, %v1286_v3  ;;  %v216_v35 = vpop.f32.mrb[9].mxu0 }
 0x126   :  { %v217_v36 = vadd.f32 %v216_v35, %v1289_v4  ;;  %v218_v37 = vpop.f32.mrb[10].mxu0  ;;  %567 = vmatprep.mubr.bf16.mxu0 %v308_v32 }
 0x127   :  { %v219_v38 = vadd.f32 %v218_v37, %v1286_v3  ;;  %v220_v39 = vpop.f32.mrb[11].mxu0  ;;  %568 = vmatmul.mubr.bf16.gmra.mrb[36].mxu0 %v307_v31  ;;  %v281_v41 = vmax.f32 %v215_v34, 0.0 }
 0x128   :  { %v221_v40 = vadd.f32 %v220_v39, %v1289_v4  ;;  %v282_v43 = vmax.f32 %v217_v36, 0.0 }
 0x129   :  { %v283_v42 = vmax.f32 %v219_v38, 0.0 }
 0x12a   :  { %v284_v44 = vmax.f32 %v221_v40, 0.0 }
 0x12b   :  { %v309_v45 = vpack.c.bf16 %v283_v42, %v281_v41 }
 0x12c   :  { %v310_v46 = vpack.c.bf16 %v284_v44, %v282_v43  ;;  %v224_v47 = vpop.f32.mrb[12].mxu0 }
 0x12d   :  { %v225_v48 = vadd.f32 %v224_v47, %v1286_v3  ;;  %v226_v49 = vpop.f32.mrb[13].mxu0 }
 0x12e   :  { %v227_v50 = vadd.f32 %v226_v49, %v1289_v4  ;;  %v228_v51 = vpop.f32.mrb[14].mxu0  ;;  %577 = vmatprep.mubr.bf16.mxu0 %v310_v46 }
 0x12f   :  { %v229_v52 = vadd.f32 %v228_v51, %v1286_v3  ;;  %v230_v53 = vpop.f32.mrb[15].mxu0  ;;  %578 = vmatmul.mubr.bf16.gmra.mrb[40].mxu0 %v309_v45  ;;  %v285_v55 = vmax.f32 %v225_v48, 0.0 }
 0x130   :  { %v231_v54 = vadd.f32 %v230_v53, %v1289_v4  ;;  %v286_v57 = vmax.f32 %v227_v50, 0.0 }
 0x131   :  { %v287_v56 = vmax.f32 %v229_v52, 0.0 }
 0x132   :  { %v288_v58 = vmax.f32 %v231_v54, 0.0 }
 0x133   :  { %v311_v59 = vpack.c.bf16 %v287_v56, %v285_v55 }
 0x134   :  { %v234_v60 = vpop.f32.mrb[16].mxu0  ;;  %v312_v61 = vpack.c.bf16 %v288_v58, %v286_v57 }
 0x135   :  { %v235_v1 = vadd.f32 %v234_v60, %v1286_v3  ;;  %v236_v5 = vpop.f32.mrb[17].mxu0 }
 0x136   :  { %v237_v6 = vadd.f32 %v236_v5, %v1289_v4  ;;  %v238_v7 = vpop.f32.mrb[18].mxu0  ;;  %587 = vmatprep.mubr.bf16.mxu1 %v312_v61 }
 0x137   :  { %v239_v8 = vadd.f32 %v238_v7, %v1286_v3  ;;  %v240_v9 = vpop.f32.mrb[19].mxu0  ;;  %588 = vmatmul.mubr.bf16.vlgmr.msra.gmra.mrb[0].mxu1 %v311_v59  ;;  %v289_v11 = vmax.f32 %v235_v1, 0.0  ;;  %v353_v59 = vld [vmem:[%s1481_s4] sm:$0x3] }
 0x138   :  { %v241_v10 = vadd.f32 %v240_v9, %v1289_v4  ;;  %v290_v13 = vmax.f32 %v237_v6, 0.0  ;;  %v1327_v60 = vrot.slane %v353_v59, %v1277_v0 }
 0x139   :  { %v291_v12 = vmax.f32 %v239_v8, 0.0 }
 0x13a   :  { %v292_v14 = vmax.f32 %v241_v10, 0.0 }
 0x13b   :  { %v313_v15 = vpack.c.bf16 %v291_v12, %v289_v11 }
 0x13c   :  { %v314_v16 = vpack.c.bf16 %v292_v14, %v290_v13  ;;  %v244_v17 = vpop.f32.mrb[20].mxu0 }
 0x13d   :  { %v245_v18 = vadd.f32 %v244_v17, %v1286_v3  ;;  %v246_v19 = vpop.f32.mrb[21].mxu0 }
 0x13e   :  { %v247_v20 = vadd.f32 %v246_v19, %v1289_v4  ;;  %v248_v21 = vpop.f32.mrb[22].mxu0  ;;  %597 = vmatprep.mubr.bf16.mxu1 %v314_v16 }
 0x13f   :  { %v249_v22 = vadd.f32 %v248_v21, %v1286_v3  ;;  %v250_v23 = vpop.f32.mrb[23].mxu0  ;;  %598 = vmatmul.mubr.bf16.gmra.mrb[4].mxu1 %v313_v15  ;;  %v293_v25 = vmax.f32 %v245_v18, 0.0 }
 0x140   :  { %v251_v24 = vadd.f32 %v250_v23, %v1289_v4  ;;  %v294_v27 = vmax.f32 %v247_v20, 0.0 }
 0x141   :  { %v295_v26 = vmax.f32 %v249_v22, 0.0 }
 0x142   :  { %v296_v28 = vmax.f32 %v251_v24, 0.0 }
 0x143   :  { %v315_v29 = vpack.c.bf16 %v295_v26, %v293_v25 }
 0x144   :  { %v316_v30 = vpack.c.bf16 %v296_v28, %v294_v27  ;;  %v254_v31 = vpop.f32.mrb[24].mxu0 }
 0x145   :  { %v255_v32 = vadd.f32 %v254_v31, %v1286_v3  ;;  %v256_v33 = vpop.f32.mrb[25].mxu0 }
 0x146   :  { %v257_v34 = vadd.f32 %v256_v33, %v1289_v4  ;;  %v258_v35 = vpop.f32.mrb[26].mxu0  ;;  %607 = vmatprep.mubr.bf16.mxu1 %v316_v30 }
 0x147   :  { %v259_v36 = vadd.f32 %v258_v35, %v1286_v3  ;;  %v260_v37 = vpop.f32.mrb[27].mxu0  ;;  %608 = vmatmul.mubr.bf16.gmra.mrb[8].mxu1 %v315_v29  ;;  %v297_v39 = vmax.f32 %v255_v32, 0.0 }
 0x148   :  { %v261_v38 = vadd.f32 %v260_v37, %v1289_v4  ;;  %v298_v41 = vmax.f32 %v257_v34, 0.0 }
 0x149   :  { %v299_v40 = vmax.f32 %v259_v36, 0.0 }
 0x14a   :  { %v300_v42 = vmax.f32 %v261_v38, 0.0 }
 0x14b   :  { %v317_v43 = vpack.c.bf16 %v299_v40, %v297_v39 }
 0x14c   :  { %v318_v44 = vpack.c.bf16 %v300_v42, %v298_v41  ;;  %v264_v45 = vpop.f32.mrb[28].mxu0 }
 0x14d   :  { %v265_v46 = vadd.f32 %v264_v45, %v1286_v3  ;;  %v266_v47 = vpop.f32.mrb[29].mxu0 }
 0x14e   :  { %v267_v48 = vadd.f32 %v266_v47, %v1289_v4  ;;  %v268_v49 = vpop.f32.mrb[30].mxu0  ;;  %617 = vmatprep.mubr.bf16.mxu1 %v318_v44 }
 0x14f   :  { %v269_v50 = vadd.f32 %v268_v49, %v1286_v3  ;;  %v270_v51 = vpop.f32.mrb[31].mxu0  ;;  %618 = vmatmul.mubr.bf16.gmra.mrb[12].mxu1 %v317_v43  ;;  %v301_v53 = vmax.f32 %v265_v46, 0.0  ;;  %v1330_v3 = vrot.slane %v353_v59, %v1283_v2 }
 0x150   :  { %v271_v52 = vadd.f32 %v270_v51, %v1289_v4  ;;  %v302_v55 = vmax.f32 %v267_v48, 0.0  ;;  %v670_v4 = vld [vmem:[%s1482_s5] sm:$0x3] }
 0x151   :  { %v303_v54 = vmax.f32 %v269_v50, 0.0  ;;  %v1337_v6 = vrot.slane %v670_v4, %v1277_v0  ;;  %v1341_v9 = vrot.slane %v670_v4, %v1283_v2 }
 0x152   :  { %v304_v56 = vmax.f32 %v271_v52, 0.0 }
 0x153   :  { %v319_v57 = vpack.c.bf16 %v303_v54, %v301_v53 }
 0x154   :  { %v320_v58 = vpack.c.bf16 %v304_v56, %v302_v55 }
 0x156   :  { %627 = vmatprep.mubr.bf16.mxu1 %v320_v58 }
 0x157   :  { %628 = vmatmul.mubr.bf16.gmra.mrb[16].mxu1 %v319_v57 }
 0x1f2   :  { %v559_v61 = vpop.f32.mrb[32].mxu0 }
 0x1f3   :  { %v560_v1 = vadd.f32 %v559_v61, %v1327_v60  ;;  %v561_v5 = vpop.f32.mrb[33].mxu0 }
 0x1f4   :  { %v562_v7 = vadd.f32 %v561_v5, %v1330_v3  ;;  %v563_v8 = vpop.f32.mrb[34].mxu0 }
 0x1f5   :  { %v638_v10 = vmax.f32 %v560_v1, 0.0  ;;  %v564_v11 = vadd.f32 %v563_v8, %v1327_v60  ;;  %v565_v12 = vpop.f32.mrb[35].mxu0 }
 0x1f6   :  { %v639_v13 = vmax.f32 %v562_v7, 0.0  ;;  %v566_v14 = vadd.f32 %v565_v12, %v1330_v3 }
 0x1f7   :  { %v640_v15 = vmax.f32 %v564_v11, 0.0  ;;  %v682_v16 = vmul.f32 %v1337_v6, %v638_v10 }
 0x1f8   :  { %v641_v17 = vmax.f32 %v566_v14, 0.0  ;;  %v683_v0 = vmul.f32 %v1341_v9, %v639_v13 }
 0x1f9   :  { %v684_v18 = vmul.f32 %v1337_v6, %v640_v15 }
 0x1fa   :  { %v685_v19 = vmul.f32 %v1341_v9, %v641_v17  ;;  %v569_v20 = vpop.f32.mrb[36].mxu0  ;;  %v714_v2 = vadd.f32 %v683_v0, %v682_v16 }
 0x1fb   :  { %v570_v21 = vadd.f32 %v569_v20, %v1327_v60  ;;  %v571_v22 = vpop.f32.mrb[37].mxu0 }
 0x1fc   :  { %v572_v23 = vadd.f32 %v571_v22, %v1330_v3  ;;  %v573_v24 = vpop.f32.mrb[38].mxu0  ;;  %715 = vadd.xlane.f32.xlu0 %v714_v2  ;;  %v717_v25 = vadd.f32 %v685_v19, %v684_v18 }
 0x1fd   :  { %v642_v26 = vmax.f32 %v570_v21, 0.0  ;;  %v574_v27 = vadd.f32 %v573_v24, %v1327_v60  ;;  %v575_v28 = vpop.f32.mrb[39].mxu0 }
 0x1fe   :  { %v643_v29 = vmax.f32 %v572_v23, 0.0  ;;  %v576_v30 = vadd.f32 %v575_v28, %v1330_v3 }
 0x1ff   :  { %v644_v31 = vmax.f32 %v574_v27, 0.0  ;;  %v686_v32 = vmul.f32 %v1337_v6, %v642_v26 }
 0x200   :  { %v645_v33 = vmax.f32 %v576_v30, 0.0  ;;  %718 = vadd.xlane.f32.xlu0 %v717_v25  ;;  %v687_v34 = vmul.f32 %v1341_v9, %v643_v29 }
 0x201   :  { %v688_v35 = vmul.f32 %v1337_v6, %v644_v31 }
 0x202   :  { %v689_v36 = vmul.f32 %v1341_v9, %v645_v33  ;;  %v579_v37 = vpop.f32.mrb[40].mxu0  ;;  %v720_v38 = vadd.f32 %v687_v34, %v686_v32 }
 0x203   :  { %v580_v39 = vadd.f32 %v579_v37, %v1327_v60  ;;  %v581_v40 = vpop.f32.mrb[41].mxu0 }
 0x204   :  { %v582_v41 = vadd.f32 %v581_v40, %v1330_v3  ;;  %v583_v42 = vpop.f32.mrb[42].mxu0  ;;  %721 = vadd.xlane.f32.xlu1 %v720_v38  ;;  %v723_v43 = vadd.f32 %v689_v36, %v688_v35 }
 0x205   :  { %v646_v44 = vmax.f32 %v580_v39, 0.0  ;;  %v584_v45 = vadd.f32 %v583_v42, %v1327_v60  ;;  %v585_v46 = vpop.f32.mrb[43].mxu0 }
 0x206   :  { %v647_v47 = vmax.f32 %v582_v41, 0.0  ;;  %v586_v48 = vadd.f32 %v585_v46, %v1330_v3 }
 0x207   :  { %v690_v49 = vmul.f32 %v1337_v6, %v646_v44  ;;  %v648_v50 = vmax.f32 %v584_v45, 0.0 }
 0x208   :  { %v691_v51 = vmul.f32 %v1341_v9, %v647_v47  ;;  %v649_v52 = vmax.f32 %v586_v48, 0.0  ;;  %724 = vadd.xlane.f32.xlu1 %v723_v43 }
 0x209   :  { %v692_v53 = vmul.f32 %v1337_v6, %v648_v50 }
 0x20a   :  { %v693_v54 = vmul.f32 %v1341_v9, %v649_v52  ;;  %v589_v55 = vpop.f32.mrb[0].mxu1  ;;  %v726_v56 = vadd.f32 %v691_v51, %v690_v49 }
 0x20b   :  { %v590_v57 = vadd.f32 %v589_v55, %v1327_v60  ;;  %v591_v58 = vpop.f32.mrb[1].mxu1 }
 0x20c   :  { %v592_v59 = vadd.f32 %v591_v58, %v1330_v3  ;;  %v593_v4 = vpop.f32.mrb[2].mxu1  ;;  %727 = vadd.xlane.f32.xlu0 %v726_v56  ;;  %v729_v61 = vadd.f32 %v693_v54, %v692_v53 }
 0x20d   :  { %v650_v1 = vmax.f32 %v590_v57, 0.0  ;;  %v594_v5 = vadd.f32 %v593_v4, %v1327_v60  ;;  %v595_v7 = vpop.f32.mrb[3].mxu1 }
 0x20e   :  { %v651_v8 = vmax.f32 %v592_v59, 0.0  ;;  %v596_v10 = vadd.f32 %v595_v7, %v1330_v3  ;;  %730 = vadd.xlane.f32.xlu1 %v729_v61 }
 0x20f   :  { %v694_v11 = vmul.f32 %v1337_v6, %v650_v1  ;;  %v652_v12 = vmax.f32 %v594_v5, 0.0 }
 0x210   :  { %v695_v13 = vmul.f32 %v1341_v9, %v651_v8  ;;  %v653_v14 = vmax.f32 %v596_v10, 0.0 }
 0x211   :  { %v696_v15 = vmul.f32 %v1337_v6, %v652_v12 }
 0x212   :  { %v697_v16 = vmul.f32 %v1341_v9, %v653_v14  ;;  %v599_v17 = vpop.f32.mrb[4].mxu1  ;;  %v732_v0 = vadd.f32 %v695_v13, %v694_v11 }
 0x213   :  { %v600_v18 = vadd.f32 %v599_v17, %v1327_v60  ;;  %v601_v19 = vpop.f32.mrb[5].mxu1 }
 0x214   :  { %v602_v20 = vadd.f32 %v601_v19, %v1330_v3  ;;  %v603_v2 = vpop.f32.mrb[6].mxu1  ;;  %733 = vadd.xlane.f32.xlu0 %v732_v0  ;;  %v735_v21 = vadd.f32 %v697_v16, %v696_v15 }
 0x215   :  { %v654_v22 = vmax.f32 %v600_v18, 0.0  ;;  %v604_v23 = vadd.f32 %v603_v2, %v1327_v60  ;;  %v605_v24 = vpop.f32.mrb[7].mxu1 }
 0x216   :  { %v655_v25 = vmax.f32 %v602_v20, 0.0  ;;  %v606_v26 = vadd.f32 %v605_v24, %v1330_v3  ;;  %736 = vadd.xlane.f32.xlu1 %v735_v21 }
 0x217   :  { %v698_v27 = vmul.f32 %v1337_v6, %v654_v22  ;;  %v656_v28 = vmax.f32 %v604_v23, 0.0 }
 0x218   :  { %v699_v29 = vmul.f32 %v1341_v9, %v655_v25  ;;  %v657_v30 = vmax.f32 %v606_v26, 0.0 }
 0x219   :  { %v700_v31 = vmul.f32 %v1337_v6, %v656_v28 }
 0x21a   :  { %v701_v32 = vmul.f32 %v1341_v9, %v657_v30  ;;  %v609_v33 = vpop.f32.mrb[8].mxu1  ;;  %v738_v34 = vadd.f32 %v699_v29, %v698_v27 }
 0x21b   :  { %v610_v35 = vadd.f32 %v609_v33, %v1327_v60  ;;  %v611_v36 = vpop.f32.mrb[9].mxu1 }
 0x21c   :  { %v612_v37 = vadd.f32 %v611_v36, %v1330_v3  ;;  %v613_v38 = vpop.f32.mrb[10].mxu1  ;;  %739 = vadd.xlane.f32.xlu0 %v738_v34  ;;  %v741_v39 = vadd.f32 %v701_v32, %v700_v31  ;;  %v1406_v32 = vand.u32 127, %v100_v62 }
 0x21d   :  { %v658_v40 = vmax.f32 %v610_v35, 0.0  ;;  %v614_v41 = vadd.f32 %v613_v38, %v1327_v60  ;;  %v615_v42 = vpop.f32.mrb[11].mxu1 }
 0x21e   :  { %v659_v43 = vmax.f32 %v612_v37, 0.0  ;;  %v616_v44 = vadd.f32 %v615_v42, %v1330_v3  ;;  %742 = vadd.xlane.f32.xlu1 %v741_v39  ;;  %v809_v34 = vadd.s32 4294967280, %v1406_v32  ;;  %v816_v35 = vadd.s32 4294967272, %v1406_v32 }
 0x21f   :  { %v702_v45 = vmul.f32 %v1337_v6, %v658_v40  ;;  %v660_v46 = vmax.f32 %v614_v41, 0.0  ;;  %v823_v36 = vadd.s32 4294967264, %v1406_v32  ;;  %v800_v39 = vsub.s32 %v1406_v32, %v1274_v63 }
 0x220   :  { %v703_v47 = vmul.f32 %v1341_v9, %v659_v43  ;;  %v661_v48 = vmax.f32 %v616_v44, 0.0  ;;  %v812_v40 = vsub.s32 %v809_v34, %v1274_v63  ;;  %v819_v43 = vsub.s32 %v816_v35, %v1274_v63 }
 0x221   :  { %v704_v49 = vmul.f32 %v1337_v6, %v660_v46  ;;  %v826_v46 = vsub.s32 %v823_v36, %v1274_v63  ;;  %v886_v35 = vadd.s32 4294967192, %v1406_v32 }
 0x222   :  { %v705_v50 = vmul.f32 %v1341_v9, %v661_v48  ;;  %v619_v51 = vpop.f32.mrb[12].mxu1  ;;  %v744_v52 = vadd.f32 %v703_v47, %v702_v45  ;;  %v830_v45 = vadd.s32 4294967256, %v1406_v32 }
 0x223   :  { %v620_v53 = vadd.f32 %v619_v51, %v1327_v60  ;;  %v621_v54 = vpop.f32.mrb[13].mxu1 }
 0x224   :  { %v622_v55 = vadd.f32 %v621_v54, %v1330_v3  ;;  %v623_v56 = vpop.f32.mrb[14].mxu1  ;;  %745 = vadd.xlane.f32.xlu0 %v744_v52  ;;  %v747_v57 = vadd.f32 %v705_v50, %v704_v49  ;;  %v837_v49 = vadd.s32 4294967248, %v1406_v32 }
 0x225   :  { %v662_v58 = vmax.f32 %v620_v53, 0.0  ;;  %v624_v59 = vadd.f32 %v623_v56, %v1327_v60  ;;  %v625_v4 = vpop.f32.mrb[15].mxu1  ;;  %v844_v53 = vadd.s32 4294967240, %v1406_v32  ;;  %v833_v56 = vsub.s32 %v830_v45, %v1274_v63 }
 0x226   :  { %v663_v61 = vmax.f32 %v622_v55, 0.0  ;;  %v626_v1 = vadd.f32 %v625_v4, %v1330_v3  ;;  %748 = vadd.xlane.f32.xlu1 %v747_v57 }
 0x227   :  { %v706_v5 = vmul.f32 %v1337_v6, %v662_v58  ;;  %v664_v7 = vmax.f32 %v624_v59, 0.0  ;;  %v840_v59 = vsub.s32 %v837_v49, %v1274_v63 }
 0x228   :  { %v707_v8 = vmul.f32 %v1341_v9, %v663_v61  ;;  %v665_v10 = vmax.f32 %v626_v1, 0.0  ;;  %v851_v1 = vadd.s32 4294967232, %v1406_v32 }
 0x229   :  { %v708_v11 = vmul.f32 %v1337_v6, %v664_v7 }
 0x22a   :  { %v709_v12 = vmul.f32 %v1341_v9, %v665_v10  ;;  %v629_v13 = vpop.f32.mrb[16].mxu1  ;;  %v750_v14 = vadd.f32 %v707_v8, %v706_v5  ;;  %v847_v10 = vsub.s32 %v844_v53, %v1274_v63 }
 0x22b   :  { %v630_v15 = vadd.f32 %v629_v13, %v1327_v60  ;;  %v631_v16 = vpop.f32.mrb[17].mxu1 }
 0x22c   :  { %v632_v17 = vadd.f32 %v631_v16, %v1330_v3  ;;  %v633_v0 = vpop.f32.mrb[18].mxu1  ;;  %751 = vadd.xlane.f32.xlu0 %v750_v14  ;;  %v753_v18 = vadd.f32 %v709_v12, %v708_v11  ;;  %v858_v11 = vadd.s32 4294967224, %v1406_v32 }
 0x22d   :  { %v666_v19 = vmax.f32 %v630_v15, 0.0  ;;  %v634_v20 = vadd.f32 %v633_v0, %v1327_v60  ;;  %v635_v2 = vpop.f32.mrb[19].mxu1  ;;  %v865_v15 = vadd.s32 4294967216, %v1406_v32  ;;  %v854_v0 = vsub.s32 %v851_v1, %v1274_v63 }
 0x22e   :  { %v667_v21 = vmax.f32 %v632_v17, 0.0  ;;  %v636_v22 = vadd.f32 %v635_v2, %v1330_v3  ;;  %754 = vadd.xlane.f32.xlu1 %v753_v18  ;;  %v802_v3 = vadd.s32 4294967288, %v1406_v32  ;;  %v861_v2 = vsub.s32 %v858_v11, %v1274_v63 }
 0x22f   :  { %v710_v23 = vmul.f32 %v1337_v6, %v666_v19  ;;  %v668_v24 = vmax.f32 %v634_v20, 0.0 }
 0x230   :  { %v711_v25 = vmul.f32 %v1341_v9, %v667_v21  ;;  %v669_v26 = vmax.f32 %v636_v22, 0.0  ;;  %v805_v37 = vsub.s32 %v802_v3, %v1274_v63  ;;  %v872_v21 = vadd.s32 4294967208, %v1406_v32 }
 0x231   :  { %v712_v27 = vmul.f32 %v1337_v6, %v668_v24  ;;  %v1414_v6 = vstv %s1483_s6  ;;  %s1163_s6 = smov [#allocation9]  }
 0x232   :  { %v713_v28 = vmul.f32 %v1341_v9, %v669_v26  ;;  %v756_v29 = vadd.f32 %v711_v25, %v710_v23  ;;  %v868_v25 = vsub.s32 %v865_v15, %v1274_v63  ;;  %s915_s19 = sshll.u32 %s1163_s6, 4  ;;  %s916_s19 = int_to_ptr.vmem [resolvable:$true] %s915_s19 }
 0x233   :  { %s1129_s20 = scalar_lea.vmem %s916_s19, 16  ;;  %s1133_s21 = scalar_lea.vmem %s916_s19, 32 }
 0x234   :  { %757 = vadd.xlane.f32.xlu0 %v756_v29  ;;  %v759_v30 = vadd.f32 %v713_v28, %v712_v27  ;;  %p1130_p10 = scmp.ne.s32.totalorder %s916_s19, %s1129_s20  ;;  %p1134_p11 = scmp.lt.s32.totalorder %s916_s19, %s916_s19 }
 0x235   :  { %p1135_p12 = scmp.lt.s32.totalorder %s1133_s21, %s1129_s20 }
 0x236   :  { %760 = vadd.xlane.f32.xlu1 %v759_v30  ;;  %v879_v30 = vadd.s32 4294967200, %v1406_v32 }
 0x237   :  { %p1136_p13 = por %p1135_p12, %p1134_p11 }
 0x239   :  { %p1137_p0 = pnand %p1136_p13, %p1130_p10 }
 0x289   :  { %v716_v60 = vpop.xlane.xlu0 %715 }
 0x28a   :  { %v764_v42 = vadd.f32 %v1414_v6, %v716_v60  ;;  %v875_v60 = vsub.s32 %v872_v21, %v1274_v63 }
 0x28c   :  { %v801_v54 = vrot.slane %v764_v42, %v800_v39  ;;  %v893_v39 = vadd.s32 4294967184, %v1406_v32  ;;  %v889_v42 = vsub.s32 %v886_v35, %v1274_v63 }
 0x28d   :  { %v719_v33 = vpop.xlane.xlu0 %718 }
 0x28e   :  { %v765_v62 = vadd.f32 %v1414_v6, %v719_v33 }
 0x290   :  { %v806_v50 = vrot.slane %v765_v62, %v805_v37  ;;  %v882_v37 = vsub.s32 %v879_v30, %v1274_v63 }
 0x291   :  { %v722_v31 = vpop.xlane.xlu1 %721 }
 0x292   :  { %v766_v41 = vadd.f32 %v1414_v6, %v722_v31  ;;  %v808_v5 = vsel %vm807_vm2, %v806_v50, %v801_v54 }
 0x294   :  { %v813_v52 = vrot.slane %v766_v41, %v812_v40 }
 0x295   :  { %v725_v9 = vpop.xlane.xlu1 %724 }
 0x296   :  { %v767_v44 = vadd.f32 %v1414_v6, %v725_v9  ;;  %v815_v8 = vsel %vm814_vm3, %v813_v52, %v808_v5 }
 0x298   :  { %v820_v55 = vrot.slane %v767_v44, %v819_v43 }
 0x299   :  { %v728_v38 = vpop.xlane.xlu0 %727 }
 0x29a   :  { %v768_v47 = vadd.f32 %v1414_v6, %v728_v38  ;;  %v822_v12 = vsel %vm821_vm4, %v820_v55, %v815_v8 }
 0x29b   :  { %v731_v48 = vpop.xlane.xlu1 %730 }
 0x29c   :  { %v769_v57 = vadd.f32 %v1414_v6, %v731_v48  ;;  %v827_v58 = vrot.slane %v768_v47, %v826_v46  ;;  %v900_v46 = vadd.s32 4294967176, %v1406_v32  ;;  %v896_v47 = vsub.s32 %v893_v39, %v1274_v63 }
 0x29e   :  { %v834_v13 = vrot.slane %v769_v57, %v833_v56  ;;  %v829_v16 = vsel %vm828_vm5, %v827_v58, %v822_v12  ;;  %v903_v53 = vsub.s32 %v900_v46, %v1274_v63 }
 0x2a0   :  { %v836_v22 = vsel %vm835_vm6, %v834_v13, %v829_v16 }
 0x2a1   :  { %v734_v51 = vpop.xlane.xlu0 %733 }
 0x2a2   :  { %v770_v4 = vadd.f32 %v1414_v6, %v734_v51 }
 0x2a3   :  { %v737_v61 = vpop.xlane.xlu1 %736 }
 0x2a4   :  { %v771_v14 = vadd.f32 %v1414_v6, %v737_v61  ;;  %v841_v17 = vrot.slane %v770_v4, %v840_v59 }
 0x2a6   :  { %v848_v23 = vrot.slane %v771_v14, %v847_v10  ;;  %v843_v26 = vsel %vm842_vm7, %v841_v17, %v836_v22 }
 0x2a8   :  { %v850_v31 = vsel %vm849_vm8, %v848_v23, %v843_v26 }
 0x2a9   :  { %v740_v7 = vpop.xlane.xlu0 %739 }
 0x2aa   :  { %v772_v18 = vadd.f32 %v1414_v6, %v740_v7 }
 0x2ab   :  { %v743_v19 = vpop.xlane.xlu1 %742 }
 0x2ac   :  { %v773_v24 = vadd.f32 %v1414_v6, %v743_v19  ;;  %v855_v27 = vrot.slane %v772_v18, %v854_v0 }
 0x2ae   :  { %v862_v3 = vrot.slane %v773_v24, %v861_v2  ;;  %v857_v9 = vsel %vm856_vm9, %v855_v27, %v850_v31 }
 0x2b0   :  { %v864_v40 = vsel %vm863_vm10, %v862_v3, %v857_v9 }
 0x2b1   :  { %v746_v20 = vpop.xlane.xlu0 %745 }
 0x2b2   :  { %v774_v28 = vadd.f32 %v1414_v6, %v746_v20 }
 0x2b3   :  { %v749_v29 = vpop.xlane.xlu1 %748 }
 0x2b4   :  { %v775_v33 = vadd.f32 %v1414_v6, %v749_v29  ;;  %v869_v36 = vrot.slane %v774_v28, %v868_v25 }
 0x2b6   :  { %v876_v41 = vrot.slane %v775_v33, %v875_v60  ;;  %v871_v44 = vsel %vm870_vm11, %v869_v36, %v864_v40 }
 0x2b8   :  { %v878_v48 = vsel %vm877_vm12, %v876_v41, %v871_v44 }
 0x2b9   :  { %v752_v34 = vpop.xlane.xlu0 %751 }
 0x2ba   :  { %v776_v62 = vadd.f32 %v1414_v6, %v752_v34 }
 0x2bb   :  { %v755_v38 = vpop.xlane.xlu1 %754 }
 0x2bc   :  { %v777_v43 = vadd.f32 %v1414_v6, %v755_v38  ;;  %v883_v45 = vrot.slane %v776_v62, %v882_v37 }
 0x2be   :  { %v890_v49 = vrot.slane %v777_v43, %v889_v42  ;;  %v885_v51 = vsel %vm884_vm13, %v883_v45, %v878_v48 }
 0x2c0   :  { %v892_v32 = vsel %vm891_vm14, %v890_v49, %v885_v51 }
 0x2c1   :  { %v758_v50 = vpop.xlane.xlu0 %757 }
 0x2c2   :  { %v778_v52 = vadd.f32 %v1414_v6, %v758_v50 }
 0x2c3   :  { %v761_v54 = vpop.xlane.xlu1 %760 }
 0x2c4   :  { %v897_v55 = vrot.slane %v778_v52, %v896_v47  ;;  %v779_v56 = vadd.f32 %v1414_v6, %v761_v54 }
 0x2c6   :  { %v904_v57 = vrot.slane %v779_v56, %v903_v53  ;;  %v899_v58 = vsel %vm898_vm15, %v897_v55, %v892_v32 }
 0x2c8   :  { %v906_v59 = vsel %vm905_vm0, %v904_v57, %v899_v58 }
 0x2c9   :  { %908 = vst [vmem:[#allocation9] sm:$0x1] %v906_v59 }
 0x2ca   :  { %1140 = shalt.err (!%p1137_p0)
}
 0x2cb   :  { %s1141_s24 = scalar_lea.hbm %s1484_s7, 16 }
 0x2cc   :  { %p1142_p1 = scmp.ne.s32.totalorder %s1484_s7, %s1141_s24  ;;  %p1145_p2 = scmp.lt.u32.totalorder %s1141_s24, %s1484_s7 }
 0x2ce   :  { %p1147_p3 = pnand %p1145_p2, %p1142_p1 }
 0x2d0   :  { %1150 = shalt.err (!%p1147_p3)
}
 0x2d1   :  { %918 = dma.vmem_to_hbm [thread:$0]  %s916_s19, 16, %s1484_s7, [#allocation5]  }
 0x2d2   :  { %1155 = dma.done.wait [#allocation5], 16  }
 0x2d3   :  { %1156 = vsyncadd [#allocation5], 4294967280 }
 0x2d4   :  { %922 = vsyncpa [#allocation4], 1 }
 0x2d5   :  { %923 = vsyncpa [#allocation7], 1 }
 0x2d6   :  { %924 = vsyncpa [#allocation5], 1 }

</bundles_post_ra>
